<compile_context>
chip_gen: v7x
topology: tpu7x:2x2x1
jax: 0.10.0
libtpu: 0.0.40
codegen_flags: <defaults>
</compile_context>

<pallas_src>
import functools

import jax
import jax.numpy as jnp
from jax.experimental import pallas as pl
from jax.experimental.pallas import tpu as pltpu

_LANE = 128
_SUBLANE = 8


def _round_up(x, m):
    return ((x + m - 1) // m) * m


def _sigmoid(z):
    # Written out explicitly (exp + divide) to stay on the best-supported ops.
    return 1.0 / (1.0 + jnp.exp(-z))


def _apply_nonlinear(a, nonlinear):
    if nonlinear is None:
        return a
    if nonlinear == "tanh":
        return jnp.tanh(a)
    return jnp.maximum(a, 0.0)  # ReLU (PyTorch branch for any non-'tanh' string)


# --------------------------------------------------------------------------- #
# Kernels
# --------------------------------------------------------------------------- #
def _mlp_vec_out_kernel(x_ref, w1_ref, b1_ref, w2_ref, b2_ref, o_ref, *, nonlinear):
    # hidden > 0, out_dim == 1: linear1 on the MXU; the (hidden -> 1) layer as a
    # VPU multiply + XLU lane reduce (a 1-column MXU matmul would use 1/256 of
    # the array).  b2 is a scalar living in SMEM.  Output is a (tb, 1) column.
    a = jnp.dot(x_ref[...], w1_ref[...], preferred_element_type=jnp.float32) + b1_ref[...]
    y = _apply_nonlinear(a, nonlinear)
    z = jnp.sum(y * w2_ref[...], axis=-1, keepdims=True) + b2_ref[0, 0]
    o_ref[...] = _sigmoid(z).astype(o_ref.dtype)


def _mlp_mxu_out_kernel(x_ref, w1_ref, b1_ref, w2_ref, b2_ref, o_ref, *, nonlinear):
    # hidden > 0, out_dim > 1: both layers on the MXU.
    a = jnp.dot(x_ref[...], w1_ref[...], preferred_element_type=jnp.float32) + b1_ref[...]
    y = _apply_nonlinear(a, nonlinear)
    z = jnp.dot(y, w2_ref[...], preferred_element_type=jnp.float32) + b2_ref[...]
    o_ref[...] = _sigmoid(z).astype(o_ref.dtype)


def _single_layer_kernel(x_ref, w1_ref, b1_ref, o_ref):
    # hidden == 0: one linear + sigmoid.
    z = jnp.dot(x_ref[...], w1_ref[...], preferred_element_type=jnp.float32) + b1_ref[...]
    o_ref[...] = _sigmoid(z).astype(o_ref.dtype)


# --------------------------------------------------------------------------- #
# Tiling / VMEM budgeting
# --------------------------------------------------------------------------- #
def _vmem_capacity_bytes():
    try:
        info = pltpu.get_tpu_info()
        cap = getattr(info, "vmem_capacity_bytes", None)
        if cap:
            return int(cap)
    except Exception:
        pass
    return 64 * 1024 * 1024  # conservative: v7x per-TensorCore VMEM


def _choose_tile_rows(n_rows, row_bytes, resident_bytes, vmem_cap):
    # Budget = fraction of VMEM minus everything resident (weights/biases,
    # assumed double-buffered by the default pipeline even with a constant
    # index_map), spent on per-row costs (x double buffer, out double buffer,
    # pre/post-activation intermediates).
    budget = max(int(vmem_cap * 0.6) - resident_bytes, 1 << 20)
    tb = max(_SUBLANE, (budget // max(row_bytes, 1)) // _SUBLANE * _SUBLANE)
    # Per-grid-step overhead (~0.35us) is amortized by ~1-2k rows on v5e/v6e.
    tb = min(tb, 2048)
    if n_rows >= 2 * _SUBLANE:
        # Guarantee >=2 batch tiles so the "parallel" axis can split across
        # v7x's 2 TensorCores; costs one extra cheap grid step on v5e/v6e.
        tb = min(tb, max(_SUBLANE, (n_rows // 2) // _SUBLANE * _SUBLANE))
    if tb >= n_rows:
        tb = n_rows  # single tile: block == full array dim (any size allowed)
    return tb


# --------------------------------------------------------------------------- #
# Wrapper
# --------------------------------------------------------------------------- #
def binary_author_classifier(x, params, *, hidden, nonlinear):
    """Forward pass matching BinaryAuthorClassifier.forward.

    x: (B, input_size) float32.
    params: dict with w1/b1 (and w2/b2 if hidden > 0); weights stored (in, out).
    Returns (B, out_dim) float32 in (0, 1).
    """
    x = x.astype(jnp.float32)
    B, input_size = x.shape

    if hidden > 0:
        w1 = params["w1"].astype(jnp.float32)
        b1 = params["b1"].astype(jnp.float32)
        w2 = params["w2"].astype(jnp.float32)
        b2 = params["b2"].astype(jnp.float32)
        out_dim = w2.shape[1]
    else:
        w1 = params["w1"].astype(jnp.float32)
        b1 = params["b1"].astype(jnp.float32)
        out_dim = w1.shape[1]

    # ----- VMEM budgeting / batch-tile choice ------------------------------
    vmem_cap = _vmem_capacity_bytes()
    if hidden > 0:
        resident_elems = input_size * hidden + hidden + hidden * out_dim + out_dim
        act_cols = hidden
    else:
        resident_elems = input_size * out_dim + out_dim
        act_cols = 0
    # 2 pipeline buffers per resident operand + layout-padding fudge.
    resident_bytes = 2 * 4 * resident_elems + (256 << 10)
    row_bytes = 4 * (
        2 * input_size                      # x double buffer
        + 2 * _round_up(out_dim, _LANE)     # out double buffer (lane-padded in VMEM)
        + 2 * act_cols                      # pre/post-activation intermediates
    )
    tb = _choose_tile_rows(B, row_bytes, resident_bytes, vmem_cap)
    grid = (pl.cdiv(B, tb),)                # ragged last tile handled by Pallas

    needed = resident_bytes + tb * row_bytes + (4 << 20)
    vmem_limit = int(min(vmem_cap * 0.9, max(needed, 32 << 20)))
    cparams = pltpu.CompilerParams(
        dimension_semantics=("parallel",),   # batch tiles shard across v7x's 2 TCs
        vmem_limit_bytes=vmem_limit,
    )

    x_spec = pl.BlockSpec((tb, input_size), lambda i: (i, 0))
    out_spec = pl.BlockSpec((tb, out_dim), lambda i: (i, 0))
    out_shape = jax.ShapeDtypeStruct((B, out_dim), jnp.float32)

    def resident(arr):
        # Whole array resident in VMEM; constant block index across the grid.
        return pl.BlockSpec(arr.shape, lambda i: (0, 0))

    if hidden > 0:
        b1_in = b1.reshape(1, hidden)
        if out_dim == 1:
            w2_in = w2.reshape(1, hidden)        # row vector: VPU multiply + lane reduce
            b2_in = b2.reshape(1, 1)             # scalar -> SMEM
            b2_spec = pl.BlockSpec(memory_space=pltpu.MemorySpace.SMEM)
            kernel = functools.partial(_mlp_vec_out_kernel, nonlinear=nonlinear)
        else:
            w2_in = w2
            b2_in = b2.reshape(1, out_dim)
            b2_spec = resident(b2_in)
            kernel = functools.partial(_mlp_mxu_out_kernel, nonlinear=nonlinear)
        out = pl.pallas_call(
            kernel,
            out_shape=out_shape,
            grid_spec=pl.GridSpec(
                grid=grid,
                in_specs=[x_spec, resident(w1), resident(b1_in), resident(w2_in), b2_spec],
                out_specs=out_spec,
            ),
            compiler_params=cparams,
        )(x, w1, b1_in, w2_in, b2_in)
    else:
        b1_in = b1.reshape(1, out_dim)
        out = pl.pallas_call(
            _single_layer_kernel,
            out_shape=out_shape,
            grid_spec=pl.GridSpec(
                grid=grid,
                in_specs=[x_spec, resident(w1), resident(b1_in)],
                out_specs=out_spec,
            ),
            compiler_params=cparams,
        )(x, w1, b1_in)

    return out


# --------------------------------------------------------------------------- #
# Params / reference
# --------------------------------------------------------------------------- #
def init_params(key, input_size, hidden, output=1):
    """Deterministic init mimicking nn.Linear default (uniform +/- 1/sqrt(fan_in))."""
    params = {}
    if hidden > 0:
        k1, k2, k3, k4 = jax.random.split(key, 4)
        bound1 = 1.0 / (input_size ** 0.5)
        bound2 = 1.0 / (hidden ** 0.5)
        params["w1"] = jax.random.uniform(k1, (input_size, hidden), jnp.float32, -bound1, bound1)
        params["b1"] = jax.random.uniform(k2, (1, hidden), jnp.float32, -bound1, bound1)
        params["w2"] = jax.random.uniform(k3, (hidden, output), jnp.float32, -bound2, bound2)
        params["b2"] = jax.random.uniform(k4, (1, output), jnp.float32, -bound2, bound2)
    else:
        k1, k2 = jax.random.split(key, 2)
        bound1 = 1.0 / (input_size ** 0.5)
        params["w1"] = jax.random.uniform(k1, (input_size, output), jnp.float32, -bound1, bound1)
        params["b1"] = jax.random.uniform(k2, (1, output), jnp.float32, -bound1, bound1)
    return params


def reference_forward(x, params, *, hidden, nonlinear):
    # HIGHEST precision so the XLA reference matmul is true f32 (matches the
    # Pallas MXU f32 path) instead of the TPU default bf16-demoted dot.
    hi = jax.lax.Precision.HIGHEST
    if hidden > 0:
        a = jnp.dot(x, params["w1"], precision=hi) + params["b1"]
        if nonlinear is not None:
            a = jnp.tanh(a) if nonlinear == "tanh" else jnp.maximum(a, 0.0)
        z = jnp.dot(a, params["w2"], precision=hi) + params["b2"]
    else:
        z = jnp.dot(x, params["w1"], precision=hi) + params["b1"]
    return jax.nn.sigmoid(z)


# --------------------------------------------------------------------------- #
# Self-test
# --------------------------------------------------------------------------- #
if __name__ == "__main__":
    key = jax.random.PRNGKey(0)
    keys = jax.random.split(key, 8)

    def check(name, batch, input_size, hidden, output, nonlinear, kx, kp):
        x = jax.random.normal(kx, (batch, input_size), jnp.float32)
        params = init_params(kp, input_size, hidden, output)
        out = jax.block_until_ready(
            binary_author_classifier(x, params, hidden=hidden, nonlinear=nonlinear)
        )
        ref = reference_forward(x, params, hidden=hidden, nonlinear=nonlinear)
        assert out.shape == (batch, output), f"{name}: bad shape {out.shape}"
        assert bool(jnp.all(jnp.isfinite(out))), f"{name}: non-finite output"
        assert jnp.allclose(out, ref, atol=1e-5, rtol=1e-5), f"{name}: mismatch vs reference"

    # 1) Default config: MLP + tanh, out_dim=1 (VPU second layer), single tile.
    check("tanh_mlp", 8, 32, 32, 1, "tanh", keys[0], keys[1])
    # 2) hidden == 0 path, batch not a multiple of 8 (single full-array block, no padding).
    check("no_hidden", 10, 32, 0, 1, None, keys[2], keys[3])
    # 3) Multi-tile batch with a ragged last tile (exercises the parallel grid + cdiv).
    check("tiled_ragged", 610, 64, 32, 1, "tanh", keys[4], keys[5])
    # 4) ReLU branch with out_dim > 1 (MXU second layer).
    check("relu_multi_out", 24, 32, 16, 4, "relu", keys[6], keys[7])

    print("KERNEL_OK")
</pallas_src>

<mosaic_0001>
module attributes {stable_mosaic.version = 11 : i64} {
  func.func @_mlp_vec_out_kernel(%arg0: i32, %arg1: memref<8x32xf32, #tpu.memory_space<vmem>>, %arg2: memref<32x32xf32, #tpu.memory_space<vmem>>, %arg3: memref<1x32xf32, #tpu.memory_space<vmem>>, %arg4: memref<1x32xf32, #tpu.memory_space<vmem>>, %arg5: memref<1x1xf32, #tpu.memory_space<smem>>, %arg6: memref<8x1xf32, #tpu.memory_space<vmem>>) attributes {dimension_semantics = [#tpu.dimension_semantics<parallel>], iteration_bounds = array<i64: 1>, scalar_prefetch = 0 : i64, scratch_operands = 0 : i64, tpu.core_type = #tpu.core_type<tc>, window_params = [{transform_indices = @transform_0, window_bounds = array<i64: 8, 32>}, {pipeline_mode = #tpu.pipeline_mode<synchronous>, transform_indices = @transform_1, window_bounds = array<i64: 32, 32>}, {pipeline_mode = #tpu.pipeline_mode<synchronous>, transform_indices = @transform_2, window_bounds = array<i64: 1, 32>}, {pipeline_mode = #tpu.pipeline_mode<synchronous>, transform_indices = @transform_3, window_bounds = array<i64: 1, 32>}, {transform_indices = @transform_4, window_bounds = array<i64: 1, 1>}, {transform_indices = @transform_5, window_bounds = array<i64: 8, 1>}]} {
    %c0 = arith.constant 0 : index
    %c0_0 = arith.constant 0 : index
    %0 = vector.load %arg1[%c0, %c0_0] : memref<8x32xf32, #tpu.memory_space<vmem>>, vector<8x32xf32>
    %c0_1 = arith.constant 0 : index
    %c0_2 = arith.constant 0 : index
    %1 = vector.load %arg2[%c0_1, %c0_2] : memref<32x32xf32, #tpu.memory_space<vmem>>, vector<32x32xf32>
    %cst = arith.constant dense<0.000000e+00> : vector<8x32xf32>
    %2 = tpu.matmul %0, %1, %cst {dimension_numbers = #tpu.dot_dimension_numbers<[1], [0], [0], [1], [0, 0, 1, 1], [], []>} : vector<8x32xf32>, vector<32x32xf32>, vector<8x32xf32> -> vector<8x32xf32>
    %c0_3 = arith.constant 0 : index
    %c0_4 = arith.constant 0 : index
    %3 = vector.load %arg3[%c0_3, %c0_4] : memref<1x32xf32, #tpu.memory_space<vmem>>, vector<1x32xf32>
    %4 = vector.broadcast %3 : vector<1x32xf32> to vector<8x32xf32>
    %5 = arith.addf %2, %4 : vector<8x32xf32>
    %6 = math.tanh %5 : vector<8x32xf32>
    %c0_5 = arith.constant 0 : index
    %c0_6 = arith.constant 0 : index
    %7 = vector.load %arg4[%c0_5, %c0_6] : memref<1x32xf32, #tpu.memory_space<vmem>>, vector<1x32xf32>
    %8 = vector.broadcast %7 : vector<1x32xf32> to vector<8x32xf32>
    %9 = arith.mulf %6, %8 : vector<8x32xf32>
    %cst_7 = arith.constant dense<0.000000e+00> : vector<8xf32>
    %10 = vector.multi_reduction <add>, %9, %cst_7 [1] : vector<8x32xf32> to vector<8xf32>
    %11 = vector.shape_cast %10 : vector<8xf32> to vector<8x1xf32>
    %c0_8 = arith.constant 0 : index
    %c0_9 = arith.constant 0 : index
    %12 = memref.load %arg5[%c0_8, %c0_9] : memref<1x1xf32, #tpu.memory_space<smem>>
    %13 = vector.broadcast %12 : f32 to vector<8x1xf32>
    %14 = arith.addf %11, %13 : vector<8x1xf32>
    %cst_10 = arith.constant 0.000000e+00 : f32
    %15 = vector.broadcast %cst_10 : f32 to vector<8x1xf32>
    %16 = arith.subf %15, %14 : vector<8x1xf32>
    %17 = math.exp %16 : vector<8x1xf32>
    %cst_11 = arith.constant 1.000000e+00 : f32
    %18 = vector.broadcast %cst_11 : f32 to vector<8x1xf32>
    %19 = arith.addf %18, %17 : vector<8x1xf32>
    %cst_12 = arith.constant 1.000000e+00 : f32
    %20 = vector.broadcast %cst_12 : f32 to vector<8x1xf32>
    %21 = arith.divf %20, %19 : vector<8x1xf32>
    %c0_13 = arith.constant 0 : index
    %c0_14 = arith.constant 0 : index
    %22 = vector.load %arg6[%c0_13, %c0_14] : memref<8x1xf32, #tpu.memory_space<vmem>>, vector<8x1xf32>
    tpu.vector_store %arg6[%c0_13, %c0_14], %21 {strides = array<i32>} : memref<8x1xf32, #tpu.memory_space<vmem>>, vector<8x1xf32>,
    return
  }
  func.func @transform_0(%arg0: i32) -> (i32, i32) {
    %c0_i32 = arith.constant 0 : i32
    %c0_i32_0 = arith.constant 0 : i32
    return %arg0, %c0_i32 : i32, i32
  }
  func.func @transform_1(%arg0: i32) -> (i32, i32) {
    %c0_i32 = arith.constant 0 : i32
    %c0_i32_0 = arith.constant 0 : i32
    %c0_i32_1 = arith.constant 0 : i32
    return %c0_i32, %c0_i32_0 : i32, i32
  }
  func.func @transform_2(%arg0: i32) -> (i32, i32) {
    %c0_i32 = arith.constant 0 : i32
    %c0_i32_0 = arith.constant 0 : i32
    %c0_i32_1 = arith.constant 0 : i32
    return %c0_i32, %c0_i32_0 : i32, i32
  }
  func.func @transform_3(%arg0: i32) -> (i32, i32) {
    %c0_i32 = arith.constant 0 : i32
    %c0_i32_0 = arith.constant 0 : i32
    %c0_i32_1 = arith.constant 0 : i32
    return %c0_i32, %c0_i32_0 : i32, i32
  }
  func.func @transform_4(%arg0: i32) -> (i32, i32) {
    %c0_i32 = arith.constant 0 : i32
    %c0_i32_0 = arith.constant 0 : i32
    %c0_i32_1 = arith.constant 0 : i32
    return %c0_i32, %c0_i32_0 : i32, i32
  }
  func.func @transform_5(%arg0: i32) -> (i32, i32) {
    %c0_i32 = arith.constant 0 : i32
    %c0_i32_0 = arith.constant 0 : i32
    return %arg0, %c0_i32 : i32, i32
  }
}

</mosaic_0001>

<bundles_post_ra>
// kernel: tpu_custom_call.1
= control target key start
LH: loop header
LB: loop body
LE: loop exit
PB: predicated region body
PF: predicated region fallthrough
CT: control target
= control target key end

     0   :  { %11 = vsyncpa [#allocation4], 0  ;;  %s328_s0 = inlined_call_operand.hbm [shape: f32[8,32], index: 0, kind: input, shape index: {}]   ;;  %s329_s1 = inlined_call_operand.hbm [shape: f32[32,32], index: 1, kind: input, shape index: {}]   ;;  %s330_s2 = inlined_call_operand.vmem [shape: f32[1,32], index: 2, kind: input, shape index: {}]   ;;  %s331_s3 = inlined_call_operand.vmem [shape: f32[1,32], index: 3, kind: input, shape index: {}]   ;;  %s332_s4 = inlined_call_operand.<no memory space> [shape: f32[1,1], index: 4, kind: input, shape index: {}]   ;;  %s333_s5 = inlined_call_operand.vmem [shape: f32[8,1], index: 5, kind: output, shape index: {}]  }
   0x1   :  { %12 = vsyncpa [#allocation6], 0  ;;  %s248_s18 = smov [#allocation3]   ;;  %s249_s20 = smov [#allocation5]  }
   0x2   :  { %s19_s19 = sshll.u32 %s248_s18, 4  ;;  %s28_s21 = sshll.u32 %s249_s20, 4  ;;  %s20_s19 = int_to_ptr.vmem [resolvable:$true] %s19_s19  ;;  %s285_s21 = int_to_ptr.vmem [resolvable:$true] %s28_s21 }
   0x3   :  { %s200_s24 = scalar_lea.hbm %s328_s0, 128 }
   0x4   :  { %p201_p0 = scmp.ne.s32.totalorder %s328_s0, %s200_s24  ;;  %p204_p1 = scmp.lt.u32.totalorder %s200_s24, %s328_s0 }
   0x6   :  { %p206_p2 = pnand %p204_p1, %p201_p0 }
   0x8   :  { %209 = shalt.err (!%p206_p2)
}
   0x9   :  { %s210_s29 = scalar_lea.vmem %s20_s19, 128  ;;  %p215_p4 = scmp.lt.s32.totalorder %s20_s19, %s20_s19 }
   0xa   :  { %p211_p3 = scmp.ne.s32.totalorder %s20_s19, %s210_s29  ;;  %p216_p5 = scmp.lt.s32.totalorder %s210_s29, %s210_s29 }
   0xc   :  { %p217_p6 = por %p216_p5, %p215_p4 }
   0xe   :  { %p218_p7 = pnand %p217_p6, %p211_p3 }
  0x10   :  { %221 = shalt.err (!%p218_p7)
}
  0x11   :  { %22 = dma.hbm_to_vmem [thread:$0]  %s328_s0, 128, %s20_s19, [#allocation4]  }
  0x12   :  { %s222_s9 = scalar_lea.hbm %s329_s1, 512 }
  0x13   :  { %p223_p8 = scmp.ne.s32.totalorder %s329_s1, %s222_s9  ;;  %p226_p9 = scmp.lt.u32.totalorder %s222_s9, %s329_s1 }
  0x15   :  { %p228_p10 = pnand %p226_p9, %p223_p8 }
  0x17   :  { %231 = shalt.err (!%p228_p10)
}
  0x18   :  { %s232_s14 = scalar_lea.vmem %s285_s21, 512  ;;  %p237_p12 = scmp.lt.s32.totalorder %s285_s21, %s285_s21 }
  0x19   :  { %p233_p11 = scmp.ne.s32.totalorder %s285_s21, %s232_s14  ;;  %p238_p13 = scmp.lt.s32.totalorder %s232_s14, %s232_s14 }
  0x1b   :  { %p239_p0 = por %p238_p13, %p237_p12 }
  0x1d   :  { %p240_p1 = pnand %p239_p0, %p233_p11 }
  0x1f   :  { %243 = shalt.err (!%p240_p1)
}
  0x20   :  { %s250_s0 = smov 128   ;;  %s251_s15 = smov 8  }
  0x21   :  { %34 = dma.hbm_to_vmem [thread:$0]  %s329_s1, 512, %s285_s21, [#allocation6], %s250_s0, %s250_s0, %s251_s15  }
  0x22   :  { %244 = dma.done.wait [#allocation4], 128  }
  0x23   :  { %245 = vsyncadd [#allocation4], 4294967168 }
  0x24   :  { %246 = dma.done.wait [#allocation6], 512  }
  0x25   :  { %247 = vsyncadd [#allocation6], 4294966784  ;;  %v252_v0 = vmov 0.0|0.0   ;;  %vm253_vm0 = vmmov 0   ;;  %v254_v1 = vmov 0.0   ;;  %v48_v2 = vld [vmem:[#allocation5] sm:$0xff]  ;;  %v146_v17 = vstv %s332_s4 }
  0x26   :  { %181 = vmatprep.subr.bf16.mxu0 %v252_v0  ;;  %178 = vmatprep.mubr.msk.f32.mxu0 %vm253_vm0, %v254_v1  ;;  %v49_v3 = vld [vmem:[#allocation5 + $0x8] sm:$0xff]  ;;  %v50_v4 = vld [vmem:[#allocation5 + $0x10] sm:$0xff]  ;;  %v51_v6 = vld [vmem:[#allocation5 + $0x18] sm:$0xff]  ;;  %vm59_vm1 = vcmask 261120   ;;  %vm154_vm2 = vcmask 7168  }
  0x27   :  { %v182_v5 = vpack.c.bf16 %v49_v3, %v48_v2  ;;  %v185_v7 = vpack.c.bf16 %v51_v6, %v50_v4  ;;  %v47_v8 = vld [vmem:[#allocation3] sm:$0xff] }
  0x28   :  { %v162_v9 = vld [vmem:[%s330_s2] ss:$0 sm:$0xff] }
  0x29   :  { %183 = vmatpush3.bf16.msra.mxu0 %v182_v5  ;;  %v164_v13 = vld [vmem:[%s331_s3] ss:$0 sm:$0xff] }
  0x2a   :  { %184 = vmatprep.subr.bf16.mxu0 %v252_v0 }
  0x2d   :  { %186 = vmatpush3.bf16.msra.mxu0 %v185_v7 }
  0x30   :  { %179 = vmatmul.mubr.msk.f32.vlgmr.msra.gmra.mrb[0].mxu0 %vm59_vm1, %v47_v8 }
 0x103   :  { %v129_v10 = vpop.f32.mrb[0].mxu0 }
 0x104   :  { %v130_v11 = vadd.f32 %v162_v9, %v129_v10  ;;  %v180_v12 = vpop.f32.mrb[1].mxu0 }
 0x106   :  { %194 = vtanh.f32 %v130_v11 }
 0x110   :  { %v195_v14 = vpop.eup %194 }
 0x111   :  { %v141_v15 = vmul.f32 %v195_v14, %v164_v13 }
 0x113   :  { %v142_v16 = vsel %vm59_vm1, %v141_v15, 0.0 }
 0x114   :  { %143 = vadd.xlane.f32.xlu0 %v142_v16 }
 0x1a1   :  { %v144_v18 = vpop.xlane.xlu0 %143 }
 0x1a2   :  { %v147_v19 = vadd.f32 %v146_v17, %v144_v18 }
 0x1a4   :  { %v148_v20 = vsub.f32 0.0, %v147_v19 }
 0x1a6   :  { %v149_v21 = vmul.f32 1.442695, %v148_v20 }
 0x1a8   :  { %196 = vpow2.f32 %v149_v21 }
 0x1b2   :  { %v197_v22 = vpop.eup %196 }
 0x1b3   :  { %v151_v23 = vadd.f32 1.0, %v197_v22 }
 0x1b5   :  { %198 = vrcp.f32 %v151_v23 }
 0x1bf   :  { %v199_v24 = vpop.eup %198 }
 0x1c0   :  { %155 = vst.msk [vmem:[%s333_s5] sm:$0xff] %vm154_vm2, %v199_v24 }
 0x1c1   :  { %160 = vsyncpa [#allocation4], 1 }
 0x1c2   :  { %161 = vsyncpa [#allocation6], 1 }

</bundles_post_ra>
